<compile_context>
chip_gen: v6e
topology: v6e:2x2x1
jax: 0.10.0
libtpu: 0.0.40
codegen_flags: <defaults>
</compile_context>

<pallas_src>
import math

import jax
import jax.numpy as jnp
from jax.experimental import pallas as pl
from jax.experimental.pallas import tpu as pltpu


def _virtual_fp_kernel(c_ref, d_ref, o_ref):
    # c_ref: (tm, tn) slab of C; d_ref: (1, tn) VMEM-resident slice of D.
    # Broadcast-multiply across the sublane axis == C @ diag(D) for this slab.
    o_ref[...] = (c_ref[...] * d_ref[...]).astype(o_ref.dtype)


def _min_sublane(dtype) -> int:
    # f32 -> 8, bf16 -> 16, int8/fp8 -> 32 (sub-32-bit dtypes pack along sublanes).
    return max(8, 32 // jnp.dtype(dtype).itemsize)


def virtual_fp(C, D, *, tm=None, tn=None,
               target_tile_bytes=4 * 1024 * 1024, donate_c=False):
    """out[i, j] = C[i, j] * D[j]  ==  C @ torch.diag(D)."""
    M, Nr = C.shape
    assert D.shape == (Nr,)

    # Keep the whole VPU path in C's dtype (bf16-wide VPU on v6e/v7x).
    D = D.astype(C.dtype)

    itemsize = jnp.dtype(C.dtype).itemsize
    sub = _min_sublane(C.dtype)

    # --- Lane folding: make the output lane-dense when Nr % 128 != 0 ---------
    # Fold k consecutive rows into the lane axis (row-major reshape is free)
    # so stores are full unmasked 128-lane vst. D is tiled k times to match.
    fold = 1
    if Nr % 128 != 0:
        k = 128 // math.gcd(Nr, 128)
        if M % k == 0:
            fold = k
    if fold > 1:
        C_work = C.reshape(M // fold, fold * Nr)
        D_work = jnp.tile(D, fold)
    else:
        C_work = C
        D_work = D
    Mw, Nw = C_work.shape
    D2 = D_work.reshape(1, Nw)

    # --- Lane tile: full lane width unless that alone would blow VMEM --------
    if tn is None:
        # in+out double-buffered at the minimum sublane row count:
        full_lane_min_bytes = 4 * sub * Nw * itemsize
        if full_lane_min_bytes <= (40 << 20):
            tn = Nw
        else:
            tn = max(128, (min(Nw, 2048) // 128) * 128)  # 128-multiple lane tile
    tn = int(min(tn, Nw))
    grid_n = pl.cdiv(Nw, tn)

    # --- Row tile: ~target_tile_bytes per step, sublane-aligned, >= ~8 steps --
    if tm is None:
        rows = target_tile_bytes // max(1, tn * itemsize)
        tm = int(max(sub, min(Mw, rows)))
        # Keep at least ~8 row steps (megacore split + DMA overlap) when M allows.
        max_tm_for_steps = -(-Mw // 8)
        max_tm_for_steps = max(sub, ((max_tm_for_steps + sub - 1) // sub) * sub)
        tm = min(tm, max_tm_for_steps)
        tm = max(sub, (tm // sub) * sub)
    tm = int(min(tm, Mw))
    grid_m = pl.cdiv(Mw, tm)

    # --- VMEM budget: (C tile + out tile) double-buffered + resident D -------
    tile_bytes = tm * tn * itemsize
    d_bytes = tn * jnp.dtype(D2.dtype).itemsize
    needed = 2 * 2 * tile_bytes + 2 * d_bytes + (2 << 20)     # + headroom
    vmem_limit_bytes = int(min(max(needed, 16 << 20), 48 << 20))

    out = pl.pallas_call(
        _virtual_fp_kernel,
        out_shape=jax.ShapeDtypeStruct((Mw, Nw), C.dtype),
        grid_spec=pl.GridSpec(
            grid=(grid_m, grid_n),
            in_specs=[
                pl.BlockSpec((tm, tn), lambda i, j: (i, j)),  # streaming slab of C
                pl.BlockSpec((1, tn), lambda i, j: (0, j)),   # D: revisited across rows
            ],
            out_specs=pl.BlockSpec((tm, tn), lambda i, j: (i, j)),
        ),
        compiler_params=pltpu.CompilerParams(
            dimension_semantics=("parallel", "parallel"),     # shards across v7x TCs
            vmem_limit_bytes=vmem_limit_bytes,
        ),
        input_output_aliases=({0: 0} if donate_c else {}),
    )(C_work, D2)

    return out.reshape(M, Nr) if fold > 1 else out


if __name__ == "__main__":
    key = jax.random.PRNGKey(0)
    k_c, k_d, k_c2, k_c3 = jax.random.split(key, 4)

    # Case 1: small, clean shapes. Module __init__ uses torch.ones(Nr); we use
    # a deterministic random D so the column scaling is non-trivial to verify.
    M, Nr = 64, 128
    C = jax.random.normal(k_c, (M, Nr), dtype=jnp.float32)
    D = jax.random.normal(k_d, (Nr,), dtype=jnp.float32)

    out = jax.block_until_ready(virtual_fp(C, D))
    expected = C @ jnp.diag(D)
    assert out.shape == expected.shape
    assert jnp.allclose(out, expected, atol=1e-5, rtol=1e-5)

    # Case 2: ragged row count + forced small tile -> exercises the cdiv grid
    # with a masked tail block and a multi-step (pipelined) grid.
    M2 = 37
    C2 = jax.random.normal(k_c2, (M2, Nr), dtype=jnp.float32)
    out2 = jax.block_until_ready(virtual_fp(C2, D, tm=16))
    expected2 = C2 @ jnp.diag(D)
    assert out2.shape == expected2.shape
    assert jnp.allclose(out2, expected2, atol=1e-5, rtol=1e-5)

    # Case 3: Nr not a multiple of 128 + mixed dtypes (C bf16, D f32) ->
    # exercises the lane-folding path and the dtype cast.
    M3, Nr3 = 64, 32
    C3 = jax.random.normal(k_c3, (M3, Nr3), dtype=jnp.bfloat16)
    D3 = jax.random.normal(k_d, (Nr3,), dtype=jnp.float32)
    out3 = jax.block_until_ready(virtual_fp(C3, D3))
    expected3 = C3 * D3.astype(jnp.bfloat16)[None, :]
    assert out3.shape == expected3.shape
    assert jnp.allclose(out3.astype(jnp.float32), expected3.astype(jnp.float32),
                        atol=1e-2, rtol=1e-2)

    print("KERNEL_OK")
</pallas_src>

<mosaic_0001>
module attributes {stable_mosaic.version = 11 : i64} {
  func.func @_virtual_fp_kernel(%arg0: i32, %arg1: i32, %arg2: memref<8x128xf32, #tpu.memory_space<vmem>>, %arg3: memref<1x128xf32, #tpu.memory_space<vmem>>, %arg4: memref<8x128xf32, #tpu.memory_space<vmem>>) attributes {dimension_semantics = [#tpu.dimension_semantics<parallel>, #tpu.dimension_semantics<parallel>], iteration_bounds = array<i64: 8, 1>, scalar_prefetch = 0 : i64, scratch_operands = 0 : i64, tpu.core_type = #tpu.core_type<tc>, window_params = [{transform_indices = @transform_0, window_bounds = array<i64: 8, 128>}, {transform_indices = @transform_1, window_bounds = array<i64: 1, 128>}, {transform_indices = @transform_2, window_bounds = array<i64: 8, 128>}]} {
    %c0 = arith.constant 0 : index
    %c0_0 = arith.constant 0 : index
    %0 = vector.load %arg2[%c0, %c0_0] : memref<8x128xf32, #tpu.memory_space<vmem>>, vector<8x128xf32>
    %c0_1 = arith.constant 0 : index
    %c0_2 = arith.constant 0 : index
    %1 = vector.load %arg3[%c0_1, %c0_2] : memref<1x128xf32, #tpu.memory_space<vmem>>, vector<1x128xf32>
    %2 = vector.broadcast %1 : vector<1x128xf32> to vector<8x128xf32>
    %3 = arith.mulf %0, %2 : vector<8x128xf32>
    %c0_3 = arith.constant 0 : index
    %c0_4 = arith.constant 0 : index
    %4 = vector.load %arg4[%c0_3, %c0_4] : memref<8x128xf32, #tpu.memory_space<vmem>>, vector<8x128xf32>
    tpu.vector_store %arg4[%c0_3, %c0_4], %3 {strides = array<i32>} : memref<8x128xf32, #tpu.memory_space<vmem>>, vector<8x128xf32>,
    return
  }
  func.func @transform_0(%arg0: i32, %arg1: i32) -> (i32, i32) {
    %c0_i32 = arith.constant 0 : i32
    return %arg0, %arg1 : i32, i32
  }
  func.func @transform_1(%arg0: i32, %arg1: i32) -> (i32, i32) {
    %c0_i32 = arith.constant 0 : i32
    %c0_i32_0 = arith.constant 0 : i32
    return %c0_i32, %arg1 : i32, i32
  }
  func.func @transform_2(%arg0: i32, %arg1: i32) -> (i32, i32) {
    %c0_i32 = arith.constant 0 : i32
    return %arg0, %arg1 : i32, i32
  }
}

</mosaic_0001>

<bundles_post_ra>
// kernel: tpu_custom_call.1
= control target key start
LH: loop header
LB: loop body
LE: loop exit
PB: predicated region body
PF: predicated region fallthrough
CT: control target
= control target key end

     0   :  { %7 = vsyncpa [#allocation3], 0  ;;  %s646_s0 = inlined_call_operand.hbm [shape: f32[64,128], index: 0, kind: input, shape index: {}]   ;;  %s647_s1 = inlined_call_operand.vmem [shape: f32[1,128], index: 1, kind: input, shape index: {}]   ;;  %s648_s2 = inlined_call_operand.hbm [shape: f32[64,128], index: 2, kind: output, shape index: {}]  }
   0x1   :  { %9 = vsyncpa [#allocation3 + $0x1], 0 }
   0x2   :  { %10 = vsyncpa [#allocation4], 0 }
   0x3   :  { %12 = vsyncpa [#allocation4 + $0x1], 0  ;;  %s511_s9 = smov 0   ;;  %s513_s10 = smov 0  }
   0x4   :  { %s515_s11 = smov 0   ;;  %s517_s12 = smov 0  }
   0x5   :  { %s519_s13 = smov 0   ;;  %s521_s14 = smov 0  }
   0x6 LB: > { %s307_s15 = sadd.s32 4294967295, %s492_s14   ;;  %s308_s16 = sadd.s32 4294967294, %s492_s14   ;;  %s492_s14 = sphi %s521_s14, %s18_s14   ;;  %s488_s13 = sphi %s519_s13, %s659_s13   ;;  %s484_s12 = sphi %s517_s12, %s658_s12   ;;  %s480_s11 = sphi %s515_s11, %s657_s11   ;;  %s476_s10 = sphi %s513_s10, %s656_s10   ;;  %s472_s9 = sphi %s511_s9, %s655_s9  }
   0x7   : > { %s30_s17 = sadd.s32 1, %s488_s13  ;;  %s39_s18 = sadd.s32 1, %s480_s11 }
   0x8   : > { %p32_p0 = scmp.ge.s32.totalorder %s30_s17, 8  ;;  %p46_p1 = scmp.ne.s32.totalorder %s480_s11, %s476_s10 }
   0x9   : > { %p47_p2 = scmp.eq.s32.totalorder %s492_s14, 0  ;;  %p52_p3 = scmp.ne.s32.totalorder %s476_s10, %s472_s9 }
   0xa   : > { %s661_s17 = smov (%p32_p0, %s30_s17), 0  ;;  %p53_p5 = scmp.eq.s32.totalorder %s307_s15, 0 }
   0xb   : > { %p552_p4 = por %p47_p2, %p46_p1  ;;  %s34_s20 = ssub.s32 %s488_s13, %s661_s17 }
   0xc   : > { %p104_p6 = scmp.eq.s32.totalorder %s307_s15, 7  ;;  %p37_p7 = scmp.eq.s32.totalorder %s34_s20, 0 }
   0xd   : > { %p558_p8 = por %p53_p5, %p52_p3  ;;  %p110_p10 = scmp.eq.s32.totalorder %s308_s16, 7 }
   0xe   : > { %p562_p9 = por %p104_p6, %p46_p1  ;;  %p334_p12 = scmp.lt.s32.totalorder %s492_s14, 8 }
   0xf   : > { %s567_s23 = scalar_select %p37_p7, %s480_s11, %s39_s18  }
  0x10   : > { %p569_p11 = por %p110_p10, %p52_p3  ;;  %s136_s25 = sand.u32 1, %s480_s11  }
  0x11   : > { %s312_s26 = sshll.u32 %s136_s25, 3  ;;  %s313_s27 = sshll.u32 %s488_s13, 7 }
  0x12   : > { %s652_s24 = scalar_select %p569_p11, 1, 0 }
  0x13   : > { %s146_s30 = scalar_lea.hbm %s646_s0, %s313_s27  ;;  %s140_s3 = scalar_lea.vmem [#allocation2], %s312_s26 }
  0x14   : > { %s148_s4 = sshll.u32 %s140_s3, 4  ;;  %p581_p13 = pnand %p334_p12, %p552_p4  ;;  %s149_s4 = int_to_ptr.vmem [resolvable:$true] %s148_s4 }
  0x15   : > { %p314_p0 = scmp.ge.s32.totalorder %s492_s14, 1  ;;  %p153_p1 = scmp.lt.s32.totalorder %s492_s14, 9 }
  0x16   : > { %s137_s6 = scalar_lea.sflag [#allocation3], %s136_s25  ;;  %p386_p2 = pneg %p581_p13 }
  0x17   : > { %s397_s7 = scalar_lea.vmem %s149_s4, 128  ;;  %s494_s8 = smov [#allocation2]  }
  0x18   : > { %p398_p3 = scmp.ne.s32.totalorder %s149_s4, %s397_s7  ;;  %s402_s15 = sshll.u32 %s494_s8, 4  ;;  %s403_s15 = int_to_ptr.vmem [resolvable:$false] %s402_s15 }
  0x19   : > { %s404_s16 = scalar_lea.vmem %s403_s15, 256  ;;  %p405_p7 = scmp.lt.s32.totalorder %s149_s4, %s403_s15 }
  0x1a   : > { %p400_p5 = pnand %p398_p3, %p386_p2  ;;  %p406_p10 = scmp.lt.s32.totalorder %s404_s16, %s397_s7 }
  0x1c   : > { %p401_p6 = pneg %p400_p5  ;;  %p407_p4 = por %p406_p10, %p405_p7 }
  0x1e   : > { %p408_p12 = pnand %p407_p4, %p401_p6 }
  0x20   : > { %411 = shalt.err (!%p408_p12)
}
  0x21   : > { %329 = dma.hbm_to_vmem [thread:$0]  (!%p581_p13), %s146_s30, 128, %s149_s4, %s137_s6  }
  0x22   : > { %p154_p11 = pnand %p314_p0, %p153_p1 }
  0x23   : > { %s596_s18 = sand.u32 (!%p154_p11), 1, %s476_s10  }
  0x24   : > { %157 = sbr.rel (%p154_p11) target bundleno = 66 (0x42), region = 28  ;;  %s315_s19 = sshll.u32 (!%p154_p11), %s596_s18, 3 }
  0x25   : > { %s160_s20 = scalar_lea.sflag (!%p154_p11), [#allocation3], %s596_s18  ;;  %s163_s25 = scalar_lea.vmem (!%p154_p11), [#allocation2], %s315_s19 }
  0x29   : > { %463 = dma.done.wait (%p558_p8), %s160_s20, 128  }
  0x2a   : > { %465 = vsyncadd (%p558_p8), %s160_s20, 4294967168  ;;  %s186_s26 = scalar_lea.vmem [#allocation5], %s315_s19  ;;  %s319_s28 = sshll.u32 %s484_s12, 7  ;;  %v190_v0 = vld [vmem:[%s163_s25] sm:$0xff] }
  0x2b   : > { %s215_s27 = sshll.u32 %s186_s26, 4  ;;  %v317_v1 = vld [vmem:[%s647_s1] ss:$0 sm:$0xff]  ;;  %s213_s5 = scalar_lea.hbm %s648_s2, %s319_s28  ;;  %s216_s27 = int_to_ptr.vmem [resolvable:$true] %s215_s27 }
  0x2c   : > { %v198_v2 = vmul.f32 %v317_v1, %v190_v0  ;;  %s201_s21 = scalar_lea.sflag [#allocation4], %s596_s18  ;;  %s412_s6 = scalar_lea.vmem %s216_s27, 128 }
  0x2d   : > { %p413_p8 = scmp.ne.s32.totalorder %s216_s27, %s412_s6  ;;  %s495_s7 = smov [#allocation5]  }
  0x2e   : > { %199 = vst [vmem:[%s186_s26] sm:$0xff] %v198_v2  ;;  %s416_s12 = sshll.u32 %s495_s7, 4  ;;  %s417_s12 = int_to_ptr.vmem [resolvable:$false] %s416_s12 }
  0x2f   : > { %p414_p11 = pnand %p413_p8, %p562_p9  ;;  %s418_s8 = scalar_lea.vmem %s417_s12, 256 }
  0x30   : > { %p419_p0 = scmp.lt.s32.totalorder %s216_s27, %s417_s12  ;;  %p420_p1 = scmp.lt.s32.totalorder %s418_s8, %s412_s6 }
  0x31   : > { %p415_p13 = pneg %p414_p11 }
  0x32   : > { %p421_p2 = por %p420_p1, %p419_p0 }
  0x34   : > { %p422_p3 = pnand %p421_p2, %p415_p13 }
  0x36   : > { %425 = shalt.err (!%p422_p3)
}
  0x37   : > { %s426_s15 = scalar_lea.hbm %s213_s5, 128  ;;  %s430_s19 = scalar_lea.hbm %s648_s2, 1024 }
  0x38   : > { %p427_p5 = scmp.ne.s32.totalorder %s213_s5, %s426_s15  ;;  %p431_p10 = scmp.lt.s32.totalorder %s213_s5, %s648_s2 }
  0x39   : > { %p432_p4 = scmp.lt.s32.totalorder %s430_s19, %s426_s15 }
  0x3a   : > { %p428_p6 = pnand %p427_p5, %p562_p9 }
  0x3b   : > { %p433_p12 = por %p432_p4, %p431_p10 }
  0x3c   : > { %p429_p7 = pneg %p428_p6 }
  0x3e   : > { %p434_p8 = pnand %p433_p12, %p429_p7 }
  0x40   : > { %437 = shalt.err (!%p434_p8)
}
  0x41   : > { %324 = dma.vmem_to_hbm [thread:$0]  (%p562_p9), %s216_s27, 128, %s213_s5, %s201_s21  }
  0x42 PF: > { %p335_p11 = scmp.ge.s32.totalorder %s492_s14, 2  ;;  %s227_s26 = sand.u32 1, %s472_s9  }
  0x43   : > { %p654_p13 = scmp.ne.s32.totalorder %s652_s24, 0  ;;  %s228_s28 = scalar_lea.sflag [#allocation4], %s227_s26 }
  0x45   : > { %p331_p0 = pnand %p335_p11, %p654_p13 }
  0x47   : > { %p332_p1 = pneg %p331_p0 }
  0x49   : > { %467 = dma.done.wait (%p332_p1), %s228_s28, 128  }
  0x4a   : > { %469 = vsyncadd (%p332_p1), %s228_s28, 4294967168  ;;  %s18_s14 = sadd.s32 1, %s492_s14   ;;  %s655_s9 = smov %s476_s10 }
  0x4b   : > { %p15_p2 = scmp.ge.s32.totalorder %s18_s14, 10   ;;  %s656_s10 = smov %s480_s11 }
  0x4c   : > { %s657_s11 = smov %s567_s23  ;;  %s658_s12 = smov %s488_s13 }
  0x4d   : > { %s659_s13 = smov %s661_s17  ;;  %17 = sbr.rel (!%p15_p2) target bundleno = 6 (0x6), region = 76 }
  0x52   :  { %233 = vsyncpa [#allocation3], 1 }
  0x53   :  { %235 = vsyncpa [#allocation3 + $0x1], 1 }
  0x54   :  { %236 = vsyncpa [#allocation4], 1 }
  0x55   :  { %238 = vsyncpa [#allocation4 + $0x1], 1 }

</bundles_post_ra>
